<compile_context>
chip_gen: v6e
topology: v6e:2x2x1
jax: 0.10.0
libtpu: 0.0.40
codegen_flags: <defaults>
</compile_context>

<pallas_src>
import functools

import numpy as np
import jax
import jax.numpy as jnp
from jax import lax
from jax.experimental import pallas as pl
from jax.experimental.pallas import tpu as pltpu

# Large finite negative used for masked_fill; exp(_MASK_VALUE - max) underflows
# to exactly 0 in f32, matching -inf semantics for partially-masked rows while
# keeping fully-masked rows NaN-free.
_MASK_VALUE = -1e30


# ---------------------------------------------------------------------------
# Hardware-aware configuration helpers
# ---------------------------------------------------------------------------
def _vmem_capacity_bytes() -> int:
    """Physical VMEM per core; conservative 64 MiB (v7x) if query fails."""
    try:
        info = pltpu.get_tpu_info()
        for name in ("vmem_capacity_bytes", "vmem_bytes", "vmem_size_bytes"):
            val = getattr(info, name, None)
            if val:
                return int(val)
    except Exception:
        pass
    return 64 * 1024 * 1024


def _vmem_limit_bytes(capacity: int) -> int:
    """Scoped-VMEM budget: ~96 MiB on 128 MiB parts, ~40 MiB on 64 MiB v7x."""
    if capacity >= (96 << 20):
        return 96 << 20
    return min(40 << 20, max(16 << 20, (capacity * 5) // 8))


def _choose_tile(n: int, max_tile: int) -> int:
    """Largest tile <= max_tile (>=32, sublane aligned) dividing n, else full n."""
    if n <= max_tile:
        return n
    for cand in (512, 256, 128, 64, 32):
        if cand <= max_tile and n % cand == 0:
            return cand
    return n  # irregular extent: single full block keeps the layout legal


def _kv_block_spec(block_shape, index_map, itemsize):
    """K/V spec for the full-T_k path.

    The index_map is constant along the inner q-tile grid axis, so double
    buffering only helps at batch boundaries; single-buffer big blocks to halve
    their VMEM footprint (pure headroom on v7x / bigger TQ on v5e/v6e).
    """
    nbytes = itemsize
    for d in block_shape:
        nbytes *= d
    if nbytes >= (1 << 20) and hasattr(pl, "Buffered"):
        try:
            return pl.BlockSpec(block_shape, index_map,
                                pipeline_mode=pl.Buffered(1))
        except TypeError:
            pass
    return pl.BlockSpec(block_shape, index_map)


# ---------------------------------------------------------------------------
# Kernel bodies
# ---------------------------------------------------------------------------
def _make_full_kernel(has_mask, return_attention, cast_bf16, approx_recip):
    """Full-T_k-resident kernel (exact softmax, optional attention output)."""

    def kernel(*refs):
        idx = 0
        q_ref = refs[idx]; idx += 1
        k_ref = refs[idx]; idx += 1
        v_ref = refs[idx]; idx += 1
        mask_ref = None
        if has_mask:
            mask_ref = refs[idx]; idx += 1
        out_ref = refs[idx]; idx += 1
        attn_ref = refs[idx] if return_attention else None

        q = q_ref[0]          # (TQ, D)
        k = k_ref[0]          # (T_k, D)
        v = v_ref[0]          # (T_k, D_v)
        if cast_bf16:         # bf16-native MXU on v5e/v6e/v7x; f32 accumulation
            q = q.astype(jnp.bfloat16)
            k = k.astype(jnp.bfloat16)
            v = v.astype(jnp.bfloat16)

        # scores = q @ k^T, contracting dim 1 of both operands (no transpose).
        scores = lax.dot_general(
            q, k, dimension_numbers=(((1,), (1,)), ((), ())),
            preferred_element_type=jnp.float32)

        if mask_ref is not None:
            scores = jnp.where(mask_ref[0] != 0, jnp.float32(_MASK_VALUE), scores)

        # Numerically stable softmax over the key axis.
        m = jnp.max(scores, axis=-1, keepdims=True)
        e = jnp.exp(scores - m)
        s = jnp.sum(e, axis=-1, keepdims=True)
        attn = e * pl.reciprocal(s, approx=approx_recip)

        if attn_ref is not None:
            attn_ref[0] = attn.astype(attn_ref.dtype)

        out_ref[0] = lax.dot_general(
            attn.astype(v.dtype), v,
            dimension_numbers=(((1,), (0,)), ((), ())),
            preferred_element_type=jnp.float32).astype(out_ref.dtype)

    return kernel


def _make_online_kernel(has_mask, cast_bf16, approx_recip):
    """T_k-tiled online-softmax kernel (return_attention=False only)."""

    def kernel(*refs):
        idx = 0
        q_ref = refs[idx]; idx += 1
        k_ref = refs[idx]; idx += 1
        v_ref = refs[idx]; idx += 1
        mask_ref = None
        if has_mask:
            mask_ref = refs[idx]; idx += 1
        out_ref = refs[idx]; idx += 1
        m_sc, l_sc, acc_sc = refs[idx:idx + 3]

        kv = pl.program_id(2)

        @pl.when(kv == 0)
        def _():
            m_sc[...] = jnp.full_like(m_sc, -jnp.inf)
            l_sc[...] = jnp.zeros_like(l_sc)
            acc_sc[...] = jnp.zeros_like(acc_sc)

        q = q_ref[0]          # (TQ, D)
        k = k_ref[0]          # (TK, D)
        v = v_ref[0]          # (TK, D_v)
        if cast_bf16:
            q = q.astype(jnp.bfloat16)
            k = k.astype(jnp.bfloat16)
            v = v.astype(jnp.bfloat16)

        s = lax.dot_general(
            q, k, dimension_numbers=(((1,), (1,)), ((), ())),
            preferred_element_type=jnp.float32)
        if mask_ref is not None:
            s = jnp.where(mask_ref[0] != 0, jnp.float32(_MASK_VALUE), s)

        m_prev = m_sc[...]
        m_new = jnp.maximum(m_prev, jnp.max(s, axis=-1, keepdims=True))
        alpha = jnp.exp(m_prev - m_new)
        p = jnp.exp(s - m_new)
        l_sc[...] = alpha * l_sc[...] + jnp.sum(p, axis=-1, keepdims=True)
        acc_sc[...] = alpha * acc_sc[...] + lax.dot_general(
            p.astype(v.dtype), v,
            dimension_numbers=(((1,), (0,)), ((), ())),
            preferred_element_type=jnp.float32)
        m_sc[...] = m_new

        @pl.when(kv == pl.num_programs(2) - 1)
        def _():
            out_ref[0] = (acc_sc[...] *
                          pl.reciprocal(l_sc[...], approx=approx_recip)
                          ).astype(out_ref.dtype)

    return kernel


# ---------------------------------------------------------------------------
# pallas_call wrappers
# ---------------------------------------------------------------------------
@functools.partial(
    jax.jit,
    static_argnames=("q_tile", "k_tile", "return_attention", "precision",
                     "attn_dtype", "vmem_limit"))
def _dot_product_attention_impl(q, k, v, attn_mask, *, q_tile, k_tile,
                                return_attention, precision, attn_dtype,
                                vmem_limit):
    B, T_q, D = q.shape
    _, T_k, Dk = k.shape
    D_v = v.shape[-1]
    has_mask = attn_mask is not None

    cast_bf16 = (precision == "bf16") and (q.dtype == jnp.float32)
    # EUP reciprocal is free and far more accurate than bf16 rounding; keep the
    # exact path only when full-f32 matmuls were requested.
    approx_recip = cast_bf16 or (q.dtype == jnp.bfloat16)

    TQ, TK = q_tile, k_tile
    nq = T_q // TQ
    use_online = (not return_attention) and (TK < T_k)

    # Advisory cost estimate so XLA schedules surrounding ops sensibly.
    bytes_io = (q.size * q.dtype.itemsize + k.size * k.dtype.itemsize +
                v.size * v.dtype.itemsize + B * T_q * D_v * q.dtype.itemsize)
    if has_mask:
        bytes_io += B * T_q * T_k                      # int8 mask
    if return_attention:
        bytes_io += B * T_q * T_k * np.dtype(attn_dtype).itemsize
    cost = pl.CostEstimate(flops=2 * B * T_q * T_k * (D + D_v),
                           transcendentals=B * T_q * T_k,
                           bytes_accessed=bytes_io)

    if use_online:
        nk = T_k // TK
        grid = (B, nq, nk)
        in_specs = [
            pl.BlockSpec((1, TQ, D), lambda b, qi, ki: (b, qi, 0)),
            pl.BlockSpec((1, TK, Dk), lambda b, qi, ki: (b, ki, 0)),
            pl.BlockSpec((1, TK, D_v), lambda b, qi, ki: (b, ki, 0)),
        ]
        inputs = [q, k, v]
        if has_mask:
            in_specs.append(pl.BlockSpec((1, TQ, TK), lambda b, qi, ki: (b, qi, ki)))
            inputs.append(attn_mask.astype(jnp.int8))
        out_specs = [pl.BlockSpec((1, TQ, D_v), lambda b, qi, ki: (b, qi, 0))]
        out_shape = [jax.ShapeDtypeStruct((B, T_q, D_v), q.dtype)]
        scratch = [pltpu.VMEM((TQ, 1), jnp.float32),
                   pltpu.VMEM((TQ, 1), jnp.float32),
                   pltpu.VMEM((TQ, D_v), jnp.float32)]
        dims = (("parallel", "arbitrary", "arbitrary") if B > 1
                else ("parallel", "parallel", "arbitrary"))
        kernel = _make_online_kernel(has_mask, cast_bf16, approx_recip)
    else:
        grid = (B, nq)
        in_specs = [
            pl.BlockSpec((1, TQ, D), lambda b, qi: (b, qi, 0)),
            _kv_block_spec((1, T_k, Dk), lambda b, qi: (b, 0, 0), k.dtype.itemsize),
            _kv_block_spec((1, T_k, D_v), lambda b, qi: (b, 0, 0), v.dtype.itemsize),
        ]
        inputs = [q, k, v]
        if has_mask:
            in_specs.append(pl.BlockSpec((1, TQ, T_k), lambda b, qi: (b, qi, 0)))
            inputs.append(attn_mask.astype(jnp.int8))   # 4x less HBM traffic
        out_specs = [pl.BlockSpec((1, TQ, D_v), lambda b, qi: (b, qi, 0))]
        out_shape = [jax.ShapeDtypeStruct((B, T_q, D_v), q.dtype)]
        if return_attention:
            out_specs.append(pl.BlockSpec((1, TQ, T_k), lambda b, qi: (b, qi, 0)))
            out_shape.append(jax.ShapeDtypeStruct((B, T_q, T_k), attn_dtype))
        scratch = []
        # Batch is the leading "parallel" axis so a v7x megacore split does not
        # duplicate K/V HBM traffic across cores.
        dims = ("parallel", "arbitrary") if B > 1 else ("parallel", "parallel")
        kernel = _make_full_kernel(has_mask, return_attention, cast_bf16,
                                   approx_recip)

    grid_spec = pltpu.PrefetchScalarGridSpec(
        num_scalar_prefetch=0, grid=grid,
        in_specs=in_specs, out_specs=out_specs, scratch_shapes=scratch)

    results = pl.pallas_call(
        kernel,
        out_shape=tuple(out_shape),
        grid_spec=grid_spec,
        compiler_params=pltpu.CompilerParams(
            dimension_semantics=dims,
            vmem_limit_bytes=vmem_limit),
        cost_estimate=cost,
    )(*inputs)

    out = results[0]
    attn = results[1] if return_attention else None
    return out, attn


def dot_product_attention(q, k, v, attn_mask=None, *, q_tile=None, k_tile=None,
                          return_attention=True, precision="bf16",
                          attn_dtype=None):
    """Pallas equivalent of DotProductAttention.forward (dropout_rate=0.0).

    Args:
      q, k, v: (B, T_q, D), (B, T_k, D), (B, T_k, D_v).
      attn_mask: optional boolean (B, T_q, T_k); True entries are masked.
      q_tile / k_tile: optional tile sizes (must divide T_q / T_k). k_tile < T_k
        selects the online-softmax path and requires return_attention=False.
      return_attention: if False, skip the (B, T_q, T_k) attention writeback.
      precision: "bf16" (default — bf16 MXU matmuls, f32 accumulation) or
        "float32" (exact f32 matmuls).
      attn_dtype: dtype of the returned attention matrix (default q.dtype;
        bf16 halves the dominant HBM writeback for f32 callers).

    Returns:
      (output (B, T_q, D_v), attention (B, T_q, T_k) or None)
    """
    if precision not in ("bf16", "float32"):
        raise ValueError(f"precision must be 'bf16' or 'float32', got {precision!r}")
    B, T_q, _ = q.shape
    T_k = k.shape[1]

    cap = _vmem_capacity_bytes()
    vmem_limit = _vmem_limit_bytes(cap)

    if q_tile is None:
        # Generation-aware default: big tiles on 128 MiB parts, TQ<=128 on v7x
        # when T_k is long (keeps the working set inside 64 MiB VMEM).
        if cap >= (96 << 20):
            max_tile = 512 if T_k <= 2048 else 256
        else:
            max_tile = 128 if T_k > 1024 else 256
        q_tile = _choose_tile(T_q, max_tile)
    if T_q % q_tile != 0:
        raise ValueError(f"q_tile={q_tile} must divide T_q={T_q}")
    if attn_mask is not None and q_tile < 32 and q_tile != T_q:
        raise ValueError("q_tile must be >= 32 (or the full T_q) when a mask "
                         "is present: sub-32 tiles force padded int8 layouts")

    if k_tile is None:
        if (not return_attention) and T_k > 2048:
            k_tile = _choose_tile(T_k, 512)
        else:
            k_tile = T_k
    if T_k % k_tile != 0:
        raise ValueError(f"k_tile={k_tile} must divide T_k={T_k}")
    if return_attention and k_tile != T_k:
        raise ValueError("k_tile < T_k (online softmax) requires "
                         "return_attention=False")

    attn_dtype = np.dtype(attn_dtype if attn_dtype is not None else q.dtype)

    return _dot_product_attention_impl(
        q, k, v, attn_mask,
        q_tile=int(q_tile), k_tile=int(k_tile),
        return_attention=bool(return_attention), precision=precision,
        attn_dtype=attn_dtype, vmem_limit=int(vmem_limit))


# ---------------------------------------------------------------------------
# Pure-JAX reference (mirrors the PyTorch module)
# ---------------------------------------------------------------------------
def _reference(q, k, v, attn_mask=None):
    scores = jnp.einsum("bqd,bkd->bqk", q, k, preferred_element_type=jnp.float32)
    if attn_mask is not None:
        scores = jnp.where(attn_mask, -jnp.inf, scores)
    attn = jax.nn.softmax(scores, axis=-1)
    out = jnp.einsum("bqk,bkd->bqd", attn, v, preferred_element_type=jnp.float32)
    return out.astype(q.dtype), attn


if __name__ == "__main__":
    key = jax.random.PRNGKey(0)

    # --- 1. small shapes matching the module, exact-f32 path, with mask -----
    kq, kk, kv = jax.random.split(key, 3)
    B, T_q, T_k, D, D_v = 2, 8, 8, 32, 32
    q = jax.random.normal(kq, (B, T_q, D), dtype=jnp.float32)
    k = jax.random.normal(kk, (B, T_k, D), dtype=jnp.float32)
    v = jax.random.normal(kv, (B, T_k, D_v), dtype=jnp.float32)
    attn_mask = jnp.zeros((B, T_q, T_k), dtype=bool).at[:, :, -1].set(True)

    out, attn = dot_product_attention(q, k, v, attn_mask, precision="float32")
    jax.block_until_ready((out, attn))
    out_ref, attn_ref = _reference(q, k, v, attn_mask)
    assert jnp.allclose(attn, attn_ref, atol=1e-5, rtol=1e-5)
    assert jnp.allclose(out, out_ref, atol=1e-5, rtol=1e-5)

    # --- 2. default bf16-MXU path, no mask (compare vs bf16-rounded ref) ----
    out_b, attn_b = dot_product_attention(q, k, v, None)  # precision="bf16"
    jax.block_until_ready((out_b, attn_b))
    qb = q.astype(jnp.bfloat16).astype(jnp.float32)
    kb = k.astype(jnp.bfloat16).astype(jnp.float32)
    vb = v.astype(jnp.bfloat16).astype(jnp.float32)
    out_ref_b, attn_ref_b = _reference(qb, kb, vb, None)
    assert jnp.allclose(attn_b, attn_ref_b, atol=2e-2, rtol=2e-2)
    assert jnp.allclose(out_b, out_ref_b, atol=2e-2, rtol=2e-2)

    # --- 3. q-tiled path with mask (exact precision), plus bf16 attn out ----
    k2q, k2k, k2v = jax.random.split(jax.random.PRNGKey(1), 3)
    B2, T_q2, T_k2, D2, D_v2 = 2, 128, 128, 32, 128
    q2 = jax.random.normal(k2q, (B2, T_q2, D2), dtype=jnp.float32)
    k2 = jax.random.normal(k2k, (B2, T_k2, D2), dtype=jnp.float32)
    v2 = jax.random.normal(k2v, (B2, T_k2, D_v2), dtype=jnp.float32)
    mask2 = jnp.zeros((B2, T_q2, T_k2), dtype=bool).at[:, :, T_k2 // 2:].set(True)

    out2, attn2 = dot_product_attention(q2, k2, v2, mask2, q_tile=64,
                                        precision="float32")
    jax.block_until_ready((out2, attn2))
    out2_ref, attn2_ref = _reference(q2, k2, v2, mask2)
    assert jnp.allclose(attn2, attn2_ref, atol=1e-5, rtol=1e-5)
    assert jnp.allclose(out2, out2_ref, atol=1e-5, rtol=1e-5)

    out4, attn4 = dot_product_attention(q2, k2, v2, mask2, q_tile=64,
                                        attn_dtype=jnp.bfloat16)
    jax.block_until_ready((out4, attn4))
    assert attn4.dtype == jnp.bfloat16
    qb2 = q2.astype(jnp.bfloat16).astype(jnp.float32)
    kb2 = k2.astype(jnp.bfloat16).astype(jnp.float32)
    vb2 = v2.astype(jnp.bfloat16).astype(jnp.float32)
    _, attn4_ref = _reference(qb2, kb2, vb2, mask2)
    assert jnp.allclose(attn4.astype(jnp.float32), attn4_ref, atol=1e-2, rtol=1e-2)

    # --- 4. online-softmax (T_k-tiled) path, return_attention=False ---------
    k3q, k3k, k3v = jax.random.split(jax.random.PRNGKey(2), 3)
    B3, T_q3, T_k3, D3, D_v3 = 2, 128, 256, 64, 128
    q3 = jax.random.normal(k3q, (B3, T_q3, D3), dtype=jnp.float32)
    k3 = jax.random.normal(k3k, (B3, T_k3, D3), dtype=jnp.float32)
    v3 = jax.random.normal(k3v, (B3, T_k3, D_v3), dtype=jnp.float32)
    # second key tile fully masked -> exercises online rescaling edge case
    mask3 = jnp.zeros((B3, T_q3, T_k3), dtype=bool).at[:, :, T_k3 // 2:].set(True)

    out3, attn3 = dot_product_attention(q3, k3, v3, mask3, q_tile=64, k_tile=128,
                                        return_attention=False,
                                        precision="float32")
    jax.block_until_ready(out3)
    assert attn3 is None
    out3_ref, _ = _reference(q3, k3, v3, mask3)
    assert jnp.allclose(out3, out3_ref, atol=1e-4, rtol=1e-4)

    # online path, no mask, default bf16 precision
    out5, _ = dot_product_attention(q3, k3, v3, None, q_tile=64, k_tile=128,
                                    return_attention=False)
    jax.block_until_ready(out5)
    out5_ref, _ = _reference(q3.astype(jnp.bfloat16).astype(jnp.float32),
                             k3.astype(jnp.bfloat16).astype(jnp.float32),
                             v3.astype(jnp.bfloat16).astype(jnp.float32), None)
    assert jnp.allclose(out5, out5_ref, atol=2e-2, rtol=2e-2)

    print("KERNEL_OK")
</pallas_src>

<mosaic_0001>
module attributes {stable_mosaic.version = 11 : i64} {
  func.func @kernel(%arg0: i32, %arg1: i32, %arg2: memref<1x8x32xf32, #tpu.memory_space<vmem>>, %arg3: memref<1x8x32xf32, #tpu.memory_space<vmem>>, %arg4: memref<1x8x32xf32, #tpu.memory_space<vmem>>, %arg5: memref<1x8x8xi8, #tpu.memory_space<vmem>>, %arg6: memref<1x8x32xf32, #tpu.memory_space<vmem>>, %arg7: memref<1x8x8xf32, #tpu.memory_space<vmem>>) attributes {dimension_semantics = [#tpu.dimension_semantics<parallel>, #tpu.dimension_semantics<arbitrary>], iteration_bounds = array<i64: 2, 1>, scalar_prefetch = 0 : i64, scratch_operands = 0 : i64, tpu.core_type = #tpu.core_type<tc>, window_params = [{transform_indices = @transform_0, window_bounds = array<i64: 1, 8, 32>}, {transform_indices = @transform_1, window_bounds = array<i64: 1, 8, 32>}, {transform_indices = @transform_2, window_bounds = array<i64: 1, 8, 32>}, {transform_indices = @transform_3, window_bounds = array<i64: 1, 8, 8>}, {transform_indices = @transform_4, window_bounds = array<i64: 1, 8, 32>}, {transform_indices = @transform_5, window_bounds = array<i64: 1, 8, 8>}]} {
    %c0 = arith.constant 0 : index
    %c0_0 = arith.constant 0 : index
    %c0_1 = arith.constant 0 : index
    %0 = vector.load %arg2[%c0, %c0_0, %c0_1] : memref<1x8x32xf32, #tpu.memory_space<vmem>>, vector<1x8x32xf32>
    %1 = vector.shape_cast %0 : vector<1x8x32xf32> to vector<8x32xf32>
    %c0_2 = arith.constant 0 : index
    %c0_3 = arith.constant 0 : index
    %c0_4 = arith.constant 0 : index
    %2 = vector.load %arg3[%c0_2, %c0_3, %c0_4] : memref<1x8x32xf32, #tpu.memory_space<vmem>>, vector<1x8x32xf32>
    %3 = vector.shape_cast %2 : vector<1x8x32xf32> to vector<8x32xf32>
    %c0_5 = arith.constant 0 : index
    %c0_6 = arith.constant 0 : index
    %c0_7 = arith.constant 0 : index
    %4 = vector.load %arg4[%c0_5, %c0_6, %c0_7] : memref<1x8x32xf32, #tpu.memory_space<vmem>>, vector<1x8x32xf32>
    %5 = vector.shape_cast %4 : vector<1x8x32xf32> to vector<8x32xf32>
    %cst = arith.constant dense<0.000000e+00> : vector<8x8xf32>
    %6 = tpu.matmul %1, %3, %cst {dimension_numbers = #tpu.dot_dimension_numbers<[1], [1], [0], [0], [0, 0, 1, 0], [], []>} : vector<8x32xf32>, vector<8x32xf32>, vector<8x8xf32> -> vector<8x8xf32>
    %c0_8 = arith.constant 0 : index
    %c0_9 = arith.constant 0 : index
    %c0_10 = arith.constant 0 : index
    %7 = vector.load %arg5[%c0_8, %c0_9, %c0_10] : memref<1x8x8xi8, #tpu.memory_space<vmem>>, vector<1x8x8xi8>
    %8 = vector.shape_cast %7 : vector<1x8x8xi8> to vector<8x8xi8>
    %c0_i8 = arith.constant 0 : i8
    %9 = vector.broadcast %c0_i8 : i8 to vector<8x8xi8>
    %10 = arith.cmpi ne, %8, %9 : vector<8x8xi8>
    %cst_11 = arith.constant -1.000000e+30 : f32
    %11 = vector.broadcast %cst_11 : f32 to vector<8x8xf32>
    %12 = arith.select %10, %11, %6 : vector<8x8xi1>, vector<8x8xf32>
    %cst_12 = arith.constant dense<0xFF800000> : vector<8xf32>
    %13 = vector.multi_reduction <maximumf>, %12, %cst_12 [1] : vector<8x8xf32> to vector<8xf32>
    %14 = vector.shape_cast %13 : vector<8xf32> to vector<8x1xf32>
    %15 = vector.broadcast %14 : vector<8x1xf32> to vector<8x8xf32>
    %16 = arith.subf %12, %15 : vector<8x8xf32>
    %17 = math.exp %16 : vector<8x8xf32>
    %cst_13 = arith.constant dense<0.000000e+00> : vector<8xf32>
    %18 = vector.multi_reduction <add>, %17, %cst_13 [1] : vector<8x8xf32> to vector<8xf32>
    %19 = vector.shape_cast %18 : vector<8xf32> to vector<8x1xf32>
    %20 = tpu.reciprocal %19 : vector<8x1xf32> -> vector<8x1xf32>
    %21 = vector.broadcast %20 : vector<8x1xf32> to vector<8x8xf32>
    %22 = arith.mulf %17, %21 : vector<8x8xf32>
    %c0_14 = arith.constant 0 : index
    %c0_15 = arith.constant 0 : index
    %c0_16 = arith.constant 0 : index
    %23 = vector.load %arg7[%c0_14, %c0_15, %c0_16] : memref<1x8x8xf32, #tpu.memory_space<vmem>>, vector<1x8x8xf32>
    %24 = vector.shape_cast %23 : vector<1x8x8xf32> to vector<8x8xf32>
    %25 = vector.shape_cast %22 : vector<8x8xf32> to vector<1x8x8xf32>
    tpu.vector_store %arg7[%c0_14, %c0_15, %c0_16], %25 {strides = array<i32>} : memref<1x8x8xf32, #tpu.memory_space<vmem>>, vector<1x8x8xf32>,
    %cst_17 = arith.constant dense<0.000000e+00> : vector<8x32xf32>
    %26 = tpu.matmul %22, %5, %cst_17 {dimension_numbers = #tpu.dot_dimension_numbers<[1], [0], [0], [1], [0, 0, 1, 1], [], []>} : vector<8x8xf32>, vector<8x32xf32>, vector<8x32xf32> -> vector<8x32xf32>
    %c0_18 = arith.constant 0 : index
    %c0_19 = arith.constant 0 : index
    %c0_20 = arith.constant 0 : index
    %27 = vector.load %arg6[%c0_18, %c0_19, %c0_20] : memref<1x8x32xf32, #tpu.memory_space<vmem>>, vector<1x8x32xf32>
    %28 = vector.shape_cast %27 : vector<1x8x32xf32> to vector<8x32xf32>
    %29 = vector.shape_cast %26 : vector<8x32xf32> to vector<1x8x32xf32>
    tpu.vector_store %arg6[%c0_18, %c0_19, %c0_20], %29 {strides = array<i32>} : memref<1x8x32xf32, #tpu.memory_space<vmem>>, vector<1x8x32xf32>,
    return
  }
  func.func @transform_0(%arg0: i32, %arg1: i32) -> (i32, i32, i32) {
    %c0_i32 = arith.constant 0 : i32
    %c0_i32_0 = arith.constant 0 : i32
    return %arg0, %arg1, %c0_i32 : i32, i32, i32
  }
  func.func @transform_1(%arg0: i32, %arg1: i32) -> (i32, i32, i32) {
    %c0_i32 = arith.constant 0 : i32
    %c0_i32_0 = arith.constant 0 : i32
    %c0_i32_1 = arith.constant 0 : i32
    return %arg0, %c0_i32, %c0_i32_0 : i32, i32, i32
  }
  func.func @transform_2(%arg0: i32, %arg1: i32) -> (i32, i32, i32) {
    %c0_i32 = arith.constant 0 : i32
    %c0_i32_0 = arith.constant 0 : i32
    %c0_i32_1 = arith.constant 0 : i32
    return %arg0, %c0_i32, %c0_i32_0 : i32, i32, i32
  }
  func.func @transform_3(%arg0: i32, %arg1: i32) -> (i32, i32, i32) {
    %c0_i32 = arith.constant 0 : i32
    %c0_i32_0 = arith.constant 0 : i32
    return %arg0, %arg1, %c0_i32 : i32, i32, i32
  }
  func.func @transform_4(%arg0: i32, %arg1: i32) -> (i32, i32, i32) {
    %c0_i32 = arith.constant 0 : i32
    %c0_i32_0 = arith.constant 0 : i32
    return %arg0, %arg1, %c0_i32 : i32, i32, i32
  }
  func.func @transform_5(%arg0: i32, %arg1: i32) -> (i32, i32, i32) {
    %c0_i32 = arith.constant 0 : i32
    %c0_i32_0 = arith.constant 0 : i32
    return %arg0, %arg1, %c0_i32 : i32, i32, i32
  }
}

</mosaic_0001>

<bundles_post_ra>
// kernel: _dot_product_attention_impl.1
= control target key start
LH: loop header
LB: loop body
LE: loop exit
PB: predicated region body
PF: predicated region fallthrough
CT: control target
= control target key end

     0   :  { %s1354_s0 = inlined_call_operand.hbm [shape: f32[2,8,32], index: 0, kind: input, shape index: {}]   ;;  %s1355_s1 = inlined_call_operand.hbm [shape: f32[2,8,32], index: 1, kind: input, shape index: {}]   ;;  %s1356_s2 = inlined_call_operand.hbm [shape: f32[2,8,32], index: 2, kind: input, shape index: {}]   ;;  %s1357_s3 = inlined_call_operand.vmem [shape: s8[2,8,8], index: 3, kind: input, shape index: {}]   ;;  %s1358_s4 = inlined_call_operand.hbm [shape: f32[2,8,32], index: 4, kind: output, shape index: {0}]   ;;  %s1359_s5 = inlined_call_operand.hbm [shape: f32[2,8,8], index: 5, kind: output, shape index: {1}]  }
   0x1   :  { %1365 = sst [smem:[#allocation19_spill]] %s1355_s1 }
   0x2   :  { %11 = vsyncpa [#allocation3], 0 }
   0x3   :  { %13 = vsyncpa [#allocation3 + $0x1], 0 }
   0x4   :  { %14 = vsyncpa [#allocation6], 0 }
   0x5   :  { %16 = vsyncpa [#allocation6 + $0x1], 0 }
   0x6   :  { %17 = vsyncpa [#allocation4], 0 }
   0x7   :  { %19 = vsyncpa [#allocation4 + $0x1], 0 }
   0x8   :  { %20 = vsyncpa [#allocation10], 0 }
   0x9   :  { %22 = vsyncpa [#allocation10 + $0x1], 0  ;;  %s1111_s18 = smov 0   ;;  %s1113_s19 = smov 0  }
   0xa   :  { %s1115_s20 = smov 0   ;;  %s1117_s21 = smov 0  }
   0xb   :  { %s1119_s22 = smov 0   ;;  %s1121_s23 = smov 0  }
   0xc LB: > { %1366 = sst [smem:[#allocation15_spill]] %s1067_s22  ;;  %s1142_s24 = sadd.s32 4294967295, %s1071_s23   ;;  %s1071_s23 = sphi %s1121_s23, %s28_s23   ;;  %s1067_s22 = sphi %s1119_s22, %s1382_s22   ;;  %s1063_s21 = sphi %s1117_s21, %s1381_s21   ;;  %s1059_s20 = sphi %s1115_s20, %s1385_s20   ;;  %s1055_s19 = sphi %s1113_s19, %s1384_s19   ;;  %s1051_s18 = sphi %s1111_s18, %s1383_s18  }
   0xd   : > { %1367 = sst [smem:[#allocation16_spill]] %s1071_s23  ;;  %s750_s25 = sadd.s32 4294967294, %s1071_s23  }
   0xe   : > { %s40_s26 = sadd.s32 1, %s1067_s22  ;;  %s49_s27 = sadd.s32 1, %s1059_s20 }
   0xf   : > { %p42_p0 = scmp.ge.s32.totalorder %s40_s26, 2  ;;  %p56_p1 = scmp.ne.s32.totalorder %s1059_s20, %s1055_s19 }
  0x10   : > { %p57_p2 = scmp.eq.s32.totalorder %s1071_s23, 0  ;;  %p62_p3 = scmp.ne.s32.totalorder %s1055_s19, %s1051_s18 }
  0x11   : > { %s1387_s26 = smov (%p42_p0, %s40_s26), 0  ;;  %p63_p5 = scmp.eq.s32.totalorder %s1142_s24, 0 }
  0x12   : > { %1368 = sst [smem:[#allocation17_spill]] %s1387_s26  ;;  %p1154_p4 = por %p57_p2, %p56_p1 }
  0x13   : > { %s44_s29 = ssub.s32 %s1067_s22, %s1387_s26  ;;  %p168_p6 = scmp.eq.s32.totalorder %s1142_s24, 1 }
  0x14   : > { %p47_p7 = scmp.eq.s32.totalorder %s44_s29, 0  ;;  %p1162_p8 = por %p63_p5, %p62_p3 }
  0x15   : > { %p1166_p9 = por %p168_p6, %p56_p1  ;;  %p174_p10 = scmp.eq.s32.totalorder %s750_s25, 1 }
  0x16   : > { %s1171_s7 = scalar_select %p47_p7, %s1059_s20, %s49_s27  }
  0x17   : > { %p1173_p11 = por %p174_p10, %p62_p3  ;;  %p816_p13 = scmp.lt.s32.totalorder %s1071_s23, 2 }
  0x18   : > { %1372 = sst [smem:[#allocation18_spill]] %s1171_s7  ;;  %s1360_s9 = sand.u32 1, %s1059_s20  }
  0x19   : > { %s1182_s10 = sshll.u32 %s1360_s9, 3  ;;  %s1185_s11 = sshll.u32 %s1067_s22, 7 }
  0x1a   : > { %p1189_p0 = pnand %p816_p13, %p1154_p4  ;;  %s241_s13 = sand.u32 1, %s1071_s23  }
  0x1b   : > { %s1375_s1 = sld [smem:[#allocation19_spill]]  ;;  %s245_s17 = scalar_lea.vmem [#allocation5], %s1182_s10 }
  0x1c   : > { %s252_s25 = sshll.u32 %s245_s17, 4  ;;  %p759_p1 = scmp.ge.s32.totalorder %s1071_s23, 1  ;;  %s253_s25 = int_to_ptr.vmem [resolvable:$true] %s252_s25 }
  0x1d   : > { %p285_p2 = scmp.lt.s32.totalorder %s1071_s23, 3  ;;  %s1201_s27 = scalar_lea.sflag [#allocation6], %s241_s13 }
  0x1e   : > { %p875_p3 = pneg %p1189_p0  ;;  %s886_s28 = scalar_lea.vmem %s253_s25, 128 }
  0x1f   : > { %p887_p4 = scmp.ne.s32.totalorder %s253_s25, %s886_s28  ;;  %s1073_s29 = smov [#allocation5]  }
  0x20   : > { %s891_s9 = sshll.u32 %s1073_s29, 4  ;;  %s892_s9 = int_to_ptr.vmem [resolvable:$false] %s891_s9 }
  0x21   : > { %s250_s16 = scalar_lea.hbm %s1375_s1, %s1185_s11  ;;  %p889_p5 = pnand %p887_p4, %p875_p3 }
  0x22   : > { %s893_s14 = scalar_lea.vmem %s892_s9, 256  ;;  %p894_p7 = scmp.lt.s32.totalorder %s253_s25, %s892_s9 }
  0x23   : > { %p890_p6 = pneg %p889_p5  ;;  %p895_p10 = scmp.lt.s32.totalorder %s893_s14, %s886_s28 }
  0x25   : > { %p896_p13 = por %p895_p10, %p894_p7 }
  0x27   : > { %p897_p12 = pnand %p896_p13, %p890_p6 }
  0x29   : > { %900 = shalt.err (!%p897_p12)
}
  0x2a   : > { %805 = dma.hbm_to_vmem [thread:$0]  (!%p1189_p0), %s250_s16, 128, %s253_s25, %s1201_s27  }
  0x2b   : > { %p1215_p4 = pnand %p759_p1, %p285_p2  ;;  %s232_s17 = scalar_lea.hbm %s1354_s0, %s1185_s11 }
  0x2c   : > { %s226_s28 = scalar_lea.vmem [#allocation2], %s1182_s10  ;;  %s268_s26 = scalar_lea.hbm %s1356_s2, %s1185_s11 }
  0x2d   : > { %s234_s29 = sshll.u32 %s226_s28, 4  ;;  %s1377_s22 = sand.u32 1, %s1059_s20   ;;  %s235_s29 = int_to_ptr.vmem [resolvable:$true] %s234_s29 }
  0x2e   : > { %s223_s7 = scalar_lea.sflag [#allocation3], %s1377_s22  ;;  %s914_s16 = scalar_lea.vmem %s235_s29, 128 }
  0x2f   : > { %p915_p12 = scmp.ne.s32.totalorder %s235_s29, %s914_s16  ;;  %s1074_s25 = smov [#allocation2]  }
  0x30   : > { %s919_s23 = sshll.u32 %s1074_s25, 4  ;;  %s920_s23 = int_to_ptr.vmem [resolvable:$false] %s919_s23 }
  0x31   : > { %p917_p1 = pnand %p915_p12, %p875_p3  ;;  %s921_s9 = scalar_lea.vmem %s920_s23, 256 }
  0x32   : > { %p922_p5 = scmp.lt.s32.totalorder %s235_s29, %s920_s23  ;;  %p923_p6 = scmp.lt.s32.totalorder %s921_s9, %s914_s16 }
  0x33   : > { %p918_p2 = pneg %p917_p1 }
  0x34   : > { %p924_p7 = por %p923_p6, %p922_p5 }
  0x36   : > { %p925_p10 = pnand %p924_p7, %p918_p2 }
  0x38   : > { %928 = shalt.err (!%p925_p10)
}
  0x39   : > { %802 = dma.hbm_to_vmem [thread:$0]  (!%p1189_p0), %s232_s17, 128, %s235_s29, %s223_s7  }
  0x3a   : > { %s263_s1 = scalar_lea.vmem [#allocation7], %s1182_s10  ;;  %s1075_s28 = smov [#allocation7]  }
  0x3b   : > { %s270_s22 = sshll.u32 %s263_s1, 4  ;;  %s947_s23 = sshll.u32 %s1075_s28, 4  ;;  %s271_s22 = int_to_ptr.vmem [resolvable:$true] %s270_s22  ;;  %s948_s23 = int_to_ptr.vmem [resolvable:$false] %s947_s23 }
  0x3c   : > { %s942_s15 = scalar_lea.vmem %s271_s22, 128  ;;  %s949_s14 = scalar_lea.vmem %s948_s23, 256 }
  0x3d   : > { %p943_p13 = scmp.ne.s32.totalorder %s271_s22, %s942_s15  ;;  %p950_p2 = scmp.lt.s32.totalorder %s271_s22, %s948_s23 }
  0x3e   : > { %p951_p5 = scmp.lt.s32.totalorder %s949_s14, %s942_s15 }
  0x3f   : > { %p945_p12 = pnand %p943_p13, %p875_p3 }
  0x40   : > { %p952_p6 = por %p951_p5, %p950_p2 }
  0x41   : > { %p946_p1 = pneg %p945_p12 }
  0x43   : > { %p953_p7 = pnand %p952_p6, %p946_p1 }
  0x45   : > { %956 = shalt.err (!%p953_p7)
}
  0x46   : > { %808 = dma.hbm_to_vmem [thread:$0]  (!%p1189_p0), %s268_s26, 128, %s271_s22, %s1201_s27  }
  0x47   : > { %289 = sbr.rel (%p1215_p4) target bundleno = 799 (0x31f), region = 36  ;;  %s1250_s17 = sand.u32 (!%p1215_p4), 1, %s1055_s19  }
  0x48   : > { %s1253_s29 = sshll.u32 (!%p1215_p4), %s1250_s17, 3  ;;  %s292_s12 = scalar_lea.sflag (!%p1215_p4), [#allocation3], %s1250_s17 }
  0x49   : > { %s295_s16 = scalar_lea.vmem (!%p1215_p4), [#allocation2], %s1253_s29 }
  0x4c   : > { %1034 = dma.done.wait (%p1162_p8), %s292_s12, 128  }
  0x4d   : > { %1036 = vsyncadd (%p1162_p8), %s292_s12, 4294967168  ;;  %s300_s26 = sand.u32 1, %s1142_s24   ;;  %s304_s27 = scalar_lea.vmem [#allocation5], %s1253_s29 }
  0x4e   : > { %s301_s11 = scalar_lea.sflag [#allocation6], %s300_s26 }
  0x4f   : > { %1038 = dma.done.wait (%p1162_p8), %s301_s11, 256  }
  0x50   : > { %1040 = vsyncadd (%p1162_p8), %s301_s11, 4294967040  ;;  %v1076_v0 = vmov 0.0   ;;  %vm1077_vm0 = vmmov 0   ;;  %vm374_vm1 = vcmask 261120   ;;  %v372_v1 = vld [vmem:[%s304_s27] sm:$0xff]  ;;  %v371_v2 = vld [vmem:[%s295_s16] sm:$0xff] }
  0x51   : > { %779 = vmatprep.subr.mxu0 %v1076_v0  ;;  %781 = vmatprep.mubr.msk.f32.mxu0 %vm1077_vm0, %v1076_v0  ;;  %p362_p0 = scmp.lt.s32.totalorder %s1063_s21, 1  ;;  %v1078_v4 = vmov 0   ;;  %vm457_vm4 = vcmask 64512   ;;  %s313_s1 = scalar_lea.vmem [#allocation7], %s1253_s29 }
  0x52   : > { %784 = vmatprep.subr.mxu1 %v1076_v0  ;;  %786 = vmatprep.mubr.msk.f32.mxu1 %vm1077_vm0, %v1076_v0  ;;  %v373_v16 = vld [vmem:[%s313_s1] sm:$0xff]  ;;  %s361_s22 = scalar_lea.vmem [#allocation9], %s1253_s29  ;;  %s771_s15 = sshll.u32 %s1063_s21, 7 }
  0x53   : > { %780 = vmatpush3.xpose.msk.msra.mxu0 %vm374_vm1, %v372_v1  ;;  %s363_s24 = scalar_select %p362_p0, %s1063_s21, 1  ;;  %785 = vmatpush3.msra.mxu1 %v373_v16 }
  0x54   : > { %s576_s14 = scalar_lea.hbm %s1359_s5, %s771_s15  ;;  %s578_s7 = sshll.u32 %s361_s22, 4  ;;  %s579_s7 = int_to_ptr.vmem [resolvable:$true] %s578_s7 }
  0x55   : > { %s765_s13 = sshll.u32 %s363_s24, 1  ;;  %s550_s10 = scalar_lea.sflag [#allocation10], %s1250_s17 }
  0x56   : > { %782 = vmatmul.mubr.msk.f32.vlgmr.msra.gmra.mxu0 %vm374_vm1, %v371_v2  ;;  %s368_s9 = scalar_lea.vmem %s1357_s3, %s765_s13  ;;  %s957_s12 = scalar_lea.vmem %s579_s7, 128 }
  0x57   : > { %v451_v3 = vld [vmem:[%s368_s9] sm:$0x3]  ;;  %p958_p8 = scmp.ne.s32.totalorder %s579_s7, %s957_s12  ;;  %s1079_s16 = smov [#allocation9]  }
  0x58   : > { %vm452_vm2 = vnez %v451_v3  ;;  %s961_s26 = sshll.u32 %s1079_s16, 4  ;;  %s962_s26 = int_to_ptr.vmem [resolvable:$false] %s961_s26 }
  0x59   : > { %v453_v5 = vsel %vm452_vm2, 16843009, %v1078_v4  ;;  %p959_p3 = pnand %p958_p8, %p1166_p9  ;;  %s963_s11 = scalar_lea.vmem %s962_s26, 256 }
  0x5a   : > { %v454_v6 = vunpack.c.0.s8 %v453_v5  ;;  %p964_p10 = scmp.lt.s32.totalorder %s579_s7, %s962_s26  ;;  %p965_p13 = scmp.lt.s32.totalorder %s963_s11, %s957_s12 }
  0x5b   : > { %p960_p4 = pneg %p959_p3 }
  0x5c   : > { %vm455_vm3 = vcmp.ne.s32.totalorder %v454_v6, 0  ;;  %p966_p12 = por %p965_p13, %p964_p10 }
  0x5e   : > { %p967_p1 = pnand %p966_p12, %p960_p4 }
 0x116   : > { %v447_v7 = vpop.f32.mrf.mxu0 }
 0x117   : > { %v456_v8 = vsel %vm455_vm3, -1e+30, %v447_v7 }
 0x118   : > { %v783_v9 = vpop.f32.mrf.mxu0  ;;  %v458_v10 = vsel %vm457_vm4, %v456_v8, -inf }
 0x119   : > { %459 = vmax.xlane.f32.xlu0 %v458_v10 }
 0x1a2   : > { %v460_v11 = vpop.xlane.xlu0 %459 }
 0x1a3   : > { %v461_v12 = vsub.f32 %v456_v8, %v460_v11 }
 0x1a5   : > { %v462_v13 = vmul.f32 1.442695, %v461_v12 }
 0x1a7   : > { %869 = vpow2.f32 %v462_v13 }
 0x1b4   : > { %v870_v14 = vpop.eup %869 }
 0x1b5   : > { %v464_v15 = vsel %vm457_vm4, %v870_v14, 0.0 }
 0x1b6   : > { %465 = vadd.xlane.f32.xlu0 %v464_v15 }
 0x23f   : > { %v466_v17 = vpop.xlane.xlu0 %465 }
 0x240   : > { %871 = vrcp.f32 %v466_v17 }
 0x24d   : > { %v872_v18 = vpop.eup %871 }
 0x24e   : > { %v468_v19 = vmul.f32 %v872_v18, %v870_v14 }
 0x250   : > { %787 = vmatmul.mubr.msk.f32.vlgmr.msra.gmra.mxu1 %vm457_vm4, %v468_v19  ;;  %469 = vst.msk [vmem:[%s361_s22] sm:$0xff] %vm457_vm4, %v468_v19 }
 0x251   : > { %970 = shalt.err (!%p967_p1)
}
 0x252   : > { %s971_s27 = scalar_lea.hbm %s576_s14, 128  ;;  %s975_s30 = scalar_lea.hbm %s1359_s5, 256 }
 0x253   : > { %p972_p2 = scmp.ne.s32.totalorder %s576_s14, %s971_s27  ;;  %p976_p7 = scmp.lt.s32.totalorder %s576_s14, %s1359_s5 }
 0x254   : > { %p977_p0 = scmp.lt.s32.totalorder %s975_s30, %s971_s27 }
 0x255   : > { %p973_p5 = pnand %p972_p2, %p1166_p9 }
 0x256   : > { %p978_p8 = por %p977_p0, %p976_p7 }
 0x257   : > { %p974_p6 = pneg %p973_p5 }
 0x259   : > { %p979_p3 = pnand %p978_p8, %p974_p6 }
 0x25b   : > { %982 = shalt.err (!%p979_p3)
}
 0x25c   : > { %796 = dma.vmem_to_hbm [thread:$0]  (%p1166_p9), %s579_s7, 128, %s576_s14, %s550_s10  }
 0x25d   : > { %s354_s1 = scalar_lea.vmem [#allocation8], %s1253_s29  ;;  %s1305_s12 = scalar_lea.hbm %s1358_s4, %s771_s15 }
 0x25e   : > { %s564_s22 = sshll.u32 %s354_s1, 4  ;;  %s545_s16 = scalar_lea.sflag [#allocation4], %s1250_s17  ;;  %s1307_s22 = int_to_ptr.vmem [resolvable:$true] %s564_s22 }
 0x25f   : > { %s983_s26 = scalar_lea.vmem %s1307_s22, 128  ;;  %s1080_s21 = smov [#allocation8]  }
 0x260   : > { %p984_p4 = scmp.ne.s32.totalorder %s1307_s22, %s983_s26  ;;  %s987_s29 = sshll.u32 %s1080_s21, 4  ;;  %s988_s29 = int_to_ptr.vmem [resolvable:$false] %s987_s29 }
 0x261   : > { %s989_s15 = scalar_lea.vmem %s988_s29, 256  ;;  %p990_p12 = scmp.lt.s32.totalorder %s1307_s22, %s988_s29 }
 0x262   : > { %p985_p10 = pnand %p984_p4, %p1166_p9  ;;  %p991_p1 = scmp.lt.s32.totalorder %s989_s15, %s983_s26 }
 0x264   : > { %p986_p13 = pneg %p985_p10  ;;  %p992_p2 = por %p991_p1, %p990_p12 }
 0x266   : > { %p993_p5 = pnand %p992_p2, %p986_p13 }
 0x310   : > { %v539_v20 = vpop.f32.mrf.mxu1 }
 0x311   : > { %543 = vst.msk [vmem:[%s354_s1] sm:$0xff] %vm374_vm1, %v539_v20 }
 0x312   : > { %v788_v21 = vpop.f32.mrf.mxu1 }
 0x313   : > { %996 = shalt.err (!%p993_p5)
}
 0x314   : > { %s997_s14 = scalar_lea.hbm %s1305_s12, 128  ;;  %s1001_s10 = scalar_lea.hbm %s1358_s4, 256 }
 0x315   : > { %p998_p6 = scmp.ne.s32.totalorder %s1305_s12, %s997_s14  ;;  %p1002_p8 = scmp.lt.s32.totalorder %s1305_s12, %s1358_s4 }
 0x316   : > { %p1003_p3 = scmp.lt.s32.totalorder %s1001_s10, %s997_s14 }
 0x317   : > { %p999_p7 = pnand %p998_p6, %p1166_p9 }
 0x318   : > { %p1004_p4 = por %p1003_p3, %p1002_p8 }
 0x319   : > { %p1000_p0 = pneg %p999_p7 }
 0x31b   : > { %p1005_p10 = pnand %p1004_p4, %p1000_p0 }
 0x31d   : > { %1008 = shalt.err (!%p1005_p10)
}
 0x31e   : > { %795 = dma.vmem_to_hbm [thread:$0]  (%p1166_p9), %s1307_s22, 128, %s1305_s12, %s545_s16  }
 0x31f PF: > { %s1378_s24 = sld [smem:[#allocation16_spill]]  ;;  %s590_s13 = sand.u32 1, %s1051_s18  }
 0x320   : > { %s591_s30 = scalar_lea.sflag [#allocation4], %s590_s13 }
 0x325   : > { %p1379_p13 = scmp.ge.s32.totalorder %s1378_s24, 2 }
 0x327   : > { %p810_p12 = pnand %p1379_p13, %p1173_p11 }
 0x329   : > { %p811_p1 = pneg %p810_p12 }
 0x32b   : > { %1042 = dma.done.wait (%p811_p1), %s591_s30, 128  }
 0x32c   : > { %1044 = vsyncadd (%p811_p1), %s591_s30, 4294967168  ;;  %s600_s25 = scalar_lea.sflag [#allocation10], %s590_s13 }
 0x32d   : > { %1046 = dma.done.wait (%p811_p1), %s600_s25, 128  }
 0x32e   : > { %1048 = vsyncadd (%p811_p1), %s600_s25, 4294967168  ;;  %s28_s23 = sadd.s32 1, %s1378_s24   ;;  %s1380_s6 = sld [smem:[#allocation18_spill]] }
 0x32f   : > { %p25_p2 = scmp.ge.s32.totalorder %s28_s23, 4   ;;  %s1381_s21 = sld [smem:[#allocation15_spill]] }
 0x330   : > { %s1382_s22 = sld [smem:[#allocation17_spill]]  ;;  %s1383_s18 = smov %s1055_s19 }
 0x331   : > { %s1384_s19 = smov %s1059_s20  ;;  %27 = sbr.rel (!%p25_p2) target bundleno = 12 (0xc), region = 125 }
 0x334   : > { %s1385_s20 = smov %s1380_s6 }
 0x336   :  { %605 = vsyncpa [#allocation3], 1 }
 0x337   :  { %607 = vsyncpa [#allocation3 + $0x1], 1 }
 0x338   :  { %608 = vsyncpa [#allocation6], 1 }
 0x339   :  { %610 = vsyncpa [#allocation6 + $0x1], 1 }
 0x33a   :  { %611 = vsyncpa [#allocation4], 1 }
 0x33b   :  { %613 = vsyncpa [#allocation4 + $0x1], 1 }
 0x33c   :  { %614 = vsyncpa [#allocation10], 1 }
 0x33d   :  { %616 = vsyncpa [#allocation10 + $0x1], 1 }

</bundles_post_ra>
